<compile_context>
chip_gen: v7x
topology: tpu7x:2x2x1
jax: 0.10.0
libtpu: 0.0.40
codegen_flags: <defaults>
</compile_context>

<pallas_src>
import jax
import jax.numpy as jnp
from jax.experimental import pallas as pl
from jax.experimental.pallas import tpu as pltpu


def _round_up(n: int, m: int) -> int:
    return ((n + m - 1) // m) * m


def proxy_kernel(xT_ref, w1_ref, b1_ref, w3_ref, b3_ref, o_ref):
    # fc1 (transposed): h^T = W1 @ x^T + b1, then ReLU.
    #   w1_ref: [h_dim, x_dim]  (PyTorch [out, in] layout, MXU LHS)
    #   xT_ref: [x_dim, TILE_B] (batch on the lane axis)
    h = jnp.dot(w1_ref[...], xT_ref[...], preferred_element_type=jnp.float32)
    h = jnp.maximum(h + b1_ref[...], 0.0)          # b1: [h_dim, 1] lane-broadcast

    # fc3 (out_features == 1): VPU multiply + cross-sublane reduce instead of a
    # wasteful N=1 MXU matmul. Result is already lane-dense: [1, TILE_B].
    y = jnp.sum(h * w3_ref[...], axis=0, keepdims=True)   # w3: [h_dim, 1]
    o_ref[...] = (y + b3_ref[0]).astype(o_ref.dtype)       # b3: SMEM scalar


def proxy_forward(x, w1, b1, w3, b3, *, tile_b=512):
    """Proxy forward pass: relu(x @ W1^T + b1) @ W3^T + b3  ->  [B, 1].

    Parameter layouts follow PyTorch nn.Linear:
      x: [B, x_dim], w1: [h_dim, x_dim], b1: [h_dim], w3: [1, h_dim], b3: [1].
    """
    B, x_dim = x.shape
    h_dim = w1.shape[0]

    # Lane-dense batch tiling: pad B up to a multiple of 128 and of the tile.
    tile_b = min(tile_b, _round_up(B, 128))
    B_pad = _round_up(B, tile_b)
    grid_b = B_pad // tile_b

    # Layout plumbing (cheap XLA ops outside the kernel).
    xT = jnp.zeros((x_dim, B_pad), jnp.float32).at[:, :B].set(x.astype(jnp.float32).T)
    w1_f = w1.astype(jnp.float32)                       # [h_dim, x_dim]
    b1_col = b1.astype(jnp.float32).reshape(h_dim, 1)   # [h_dim, 1]
    w3_col = w3.astype(jnp.float32).reshape(h_dim, 1)   # [h_dim, 1]
    b3_s = b3.astype(jnp.float32).reshape(1)            # scalar -> SMEM

    # Explicit VMEM budget from the per-tile footprint (keeps the same tile
    # size valid on v7x's 64 MiB VMEM as on v5e/v6e's 128 MiB).
    itemsize = 4
    tile_bytes = (2 * x_dim * tile_b          # double-buffered x^T tiles
                  + 2 * tile_b                # double-buffered output tiles
                  + h_dim * x_dim + 2 * h_dim + 8) * itemsize
    vmem_limit = min(64 * 1024 * 1024, max(4 * 1024 * 1024, 4 * tile_bytes))

    out = pl.pallas_call(
        proxy_kernel,
        out_shape=jax.ShapeDtypeStruct((1, B_pad), jnp.float32),
        grid_spec=pltpu.PrefetchScalarGridSpec(
            num_scalar_prefetch=0,
            grid=(grid_b,),
            in_specs=[
                pl.BlockSpec((x_dim, tile_b), lambda i: (0, i)),      # x^T tile
                pl.BlockSpec((h_dim, x_dim), lambda i: (0, 0)),       # W1 (resident)
                pl.BlockSpec((h_dim, 1), lambda i: (0, 0)),           # b1 (resident)
                pl.BlockSpec((h_dim, 1), lambda i: (0, 0)),           # W3 (resident)
                pl.BlockSpec(memory_space=pltpu.MemorySpace.SMEM),    # b3 scalar
            ],
            out_specs=pl.BlockSpec((1, tile_b), lambda i: (0, i)),    # lane-dense row
        ),
        compiler_params=pltpu.CompilerParams(
            dimension_semantics=("parallel",),
            vmem_limit_bytes=vmem_limit,
        ),
    )(xT, w1_f, b1_col, w3_col, b3_s)

    # Drop batch padding and return the PyTorch-shaped [B, 1] result.
    return out[:, :B].T


def init_params(key, x_dim, h_dim):
    # nn.Linear-style init (uniform +/- 1/sqrt(fan_in)), PyTorch layouts.
    ks = jax.random.split(key, 6)
    bd1 = 1.0 / (x_dim ** 0.5)
    bd2 = 1.0 / (h_dim ** 0.5)
    w1 = jax.random.uniform(ks[0], (h_dim, x_dim), jnp.float32, -bd1, bd1)
    b1 = jax.random.uniform(ks[1], (h_dim,), jnp.float32, -bd1, bd1)
    # fc2 exists in __init__ but is unused in forward(); kept only for parity.
    w2 = jax.random.uniform(ks[2], (h_dim, h_dim), jnp.float32, -bd2, bd2)
    b2 = jax.random.uniform(ks[3], (h_dim,), jnp.float32, -bd2, bd2)
    w3 = jax.random.uniform(ks[4], (1, h_dim), jnp.float32, -bd2, bd2)
    b3 = jax.random.uniform(ks[5], (1,), jnp.float32, -bd2, bd2)
    return w1, b1, w2, b2, w3, b3


if __name__ == "__main__":
    x_dim, h_dim = 32, 32
    key = jax.random.PRNGKey(0)
    kx, kx2, kp = jax.random.split(key, 3)
    w1, b1, w2, b2, w3, b3 = init_params(kp, x_dim, h_dim)

    def reference(x):
        h = jnp.maximum(x @ w1.T + b1, 0.0)
        return h @ w3.T + b3

    # Small batch (single padded tile).
    x_small = jax.random.normal(kx, (8, x_dim), jnp.float32)
    out_small = jax.block_until_ready(proxy_forward(x_small, w1, b1, w3, b3))
    assert out_small.shape == (8, 1)
    assert jnp.allclose(out_small, reference(x_small), atol=1e-4, rtol=1e-4)

    # Larger non-multiple batch (multi-tile grid + padding path).
    x_big = jax.random.normal(kx2, (300, x_dim), jnp.float32)
    out_big = jax.block_until_ready(proxy_forward(x_big, w1, b1, w3, b3, tile_b=128))
    assert out_big.shape == (300, 1)
    assert jnp.allclose(out_big, reference(x_big), atol=1e-4, rtol=1e-4)

    print("KERNEL_OK")
</pallas_src>

<mosaic_0001>
module attributes {stable_mosaic.version = 11 : i64} {
  func.func @proxy_kernel(%arg0: i32, %arg1: memref<32x128xf32, #tpu.memory_space<vmem>>, %arg2: memref<32x32xf32, #tpu.memory_space<vmem>>, %arg3: memref<32x1xf32, #tpu.memory_space<vmem>>, %arg4: memref<32x1xf32, #tpu.memory_space<vmem>>, %arg5: memref<1xf32, #tpu.memory_space<smem>>, %arg6: memref<1x128xf32, #tpu.memory_space<vmem>>) attributes {dimension_semantics = [#tpu.dimension_semantics<parallel>], iteration_bounds = array<i64: 1>, scalar_prefetch = 0 : i64, scratch_operands = 0 : i64, tpu.core_type = #tpu.core_type<tc>, window_params = [{transform_indices = @transform_0, window_bounds = array<i64: 32, 128>}, {pipeline_mode = #tpu.pipeline_mode<synchronous>, transform_indices = @transform_1, window_bounds = array<i64: 32, 32>}, {pipeline_mode = #tpu.pipeline_mode<synchronous>, transform_indices = @transform_2, window_bounds = array<i64: 32, 1>}, {pipeline_mode = #tpu.pipeline_mode<synchronous>, transform_indices = @transform_3, window_bounds = array<i64: 32, 1>}, {transform_indices = @transform_4, window_bounds = array<i64: 1>}, {transform_indices = @transform_5, window_bounds = array<i64: 1, 128>}]} {
    %c0 = arith.constant 0 : index
    %c0_0 = arith.constant 0 : index
    %0 = vector.load %arg2[%c0, %c0_0] : memref<32x32xf32, #tpu.memory_space<vmem>>, vector<32x32xf32>
    %c0_1 = arith.constant 0 : index
    %c0_2 = arith.constant 0 : index
    %1 = vector.load %arg1[%c0_1, %c0_2] : memref<32x128xf32, #tpu.memory_space<vmem>>, vector<32x128xf32>
    %cst = arith.constant dense<0.000000e+00> : vector<32x128xf32>
    %2 = tpu.matmul %0, %1, %cst {dimension_numbers = #tpu.dot_dimension_numbers<[1], [0], [0], [1], [0, 0, 1, 1], [], []>} : vector<32x32xf32>, vector<32x128xf32>, vector<32x128xf32> -> vector<32x128xf32>
    %c0_3 = arith.constant 0 : index
    %c0_4 = arith.constant 0 : index
    %3 = vector.load %arg3[%c0_3, %c0_4] : memref<32x1xf32, #tpu.memory_space<vmem>>, vector<32x1xf32>
    %4 = vector.broadcast %3 : vector<32x1xf32> to vector<32x128xf32>
    %5 = arith.addf %2, %4 : vector<32x128xf32>
    %cst_5 = arith.constant 0.000000e+00 : f32
    %6 = vector.broadcast %cst_5 : f32 to vector<32x128xf32>
    %7 = arith.maximumf %5, %6 : vector<32x128xf32>
    %c0_6 = arith.constant 0 : index
    %c0_7 = arith.constant 0 : index
    %8 = vector.load %arg4[%c0_6, %c0_7] : memref<32x1xf32, #tpu.memory_space<vmem>>, vector<32x1xf32>
    %9 = vector.broadcast %8 : vector<32x1xf32> to vector<32x128xf32>
    %10 = arith.mulf %7, %9 : vector<32x128xf32>
    %cst_8 = arith.constant dense<0.000000e+00> : vector<128xf32>
    %11 = vector.multi_reduction <add>, %10, %cst_8 [0] : vector<32x128xf32> to vector<128xf32>
    %12 = vector.shape_cast %11 : vector<128xf32> to vector<1x128xf32>
    %c0_9 = arith.constant 0 : index
    %13 = memref.load %arg5[%c0_9] : memref<1xf32, #tpu.memory_space<smem>>
    %14 = vector.broadcast %13 : f32 to vector<1x128xf32>
    %15 = arith.addf %12, %14 : vector<1x128xf32>
    %c0_10 = arith.constant 0 : index
    %c0_11 = arith.constant 0 : index
    %16 = vector.load %arg6[%c0_10, %c0_11] : memref<1x128xf32, #tpu.memory_space<vmem>>, vector<1x128xf32>
    tpu.vector_store %arg6[%c0_10, %c0_11], %15 {strides = array<i32>} : memref<1x128xf32, #tpu.memory_space<vmem>>, vector<1x128xf32>,
    return
  }
  func.func @transform_0(%arg0: i32) -> (i32, i32) {
    %c0_i32 = arith.constant 0 : i32
    %c0_i32_0 = arith.constant 0 : i32
    return %c0_i32, %arg0 : i32, i32
  }
  func.func @transform_1(%arg0: i32) -> (i32, i32) {
    %c0_i32 = arith.constant 0 : i32
    %c0_i32_0 = arith.constant 0 : i32
    %c0_i32_1 = arith.constant 0 : i32
    return %c0_i32, %c0_i32_0 : i32, i32
  }
  func.func @transform_2(%arg0: i32) -> (i32, i32) {
    %c0_i32 = arith.constant 0 : i32
    %c0_i32_0 = arith.constant 0 : i32
    %c0_i32_1 = arith.constant 0 : i32
    return %c0_i32, %c0_i32_0 : i32, i32
  }
  func.func @transform_3(%arg0: i32) -> (i32, i32) {
    %c0_i32 = arith.constant 0 : i32
    %c0_i32_0 = arith.constant 0 : i32
    %c0_i32_1 = arith.constant 0 : i32
    return %c0_i32, %c0_i32_0 : i32, i32
  }
  func.func @transform_4(%arg0: i32) -> i32 {
    %c0_i32 = arith.constant 0 : i32
    %c0_i32_0 = arith.constant 0 : i32
    return %c0_i32 : i32
  }
  func.func @transform_5(%arg0: i32) -> (i32, i32) {
    %c0_i32 = arith.constant 0 : i32
    %c0_i32_0 = arith.constant 0 : i32
    return %c0_i32, %arg0 : i32, i32
  }
}

</mosaic_0001>

<bundles_post_ra>
// kernel: tpu_custom_call.1
= control target key start
LH: loop header
LB: loop body
LE: loop exit
PB: predicated region body
PF: predicated region fallthrough
CT: control target
= control target key end

     0   :  { %vm54_vm0 = vcmask 261120   ;;  %v277_v7 = vmov 0   ;;  %s376_s0 = inlined_call_operand.vmem [shape: f32[32,128], index: 0, kind: input, shape index: {}]   ;;  %s377_s1 = inlined_call_operand.vmem [shape: f32[32,32], index: 1, kind: input, shape index: {}]   ;;  %s378_s2 = inlined_call_operand.vmem [shape: f32[32,1], index: 2, kind: input, shape index: {}]   ;;  %s379_s3 = inlined_call_operand.vmem [shape: f32[32,1], index: 3, kind: input, shape index: {}]   ;;  %s380_s4 = inlined_call_operand.<no memory space> [shape: f32[1], index: 4, kind: input, shape index: {}]   ;;  %s381_s5 = inlined_call_operand.hbm [shape: f32[1,128], index: 5, kind: output, shape index: {}]  }
   0x1   :  { %v26_v0 = vld [vmem:[%s376_s0] sm:$0xff]  ;;  %v27_v1 = vld [vmem:[%s376_s0 + $0x8] sm:$0xff]  ;;  %v28_v2 = vld [vmem:[%s376_s0 + $0x10] sm:$0xff]  ;;  %251 = vset.pattern.permute.xlu0 %v277_v7  ;;  %252 = vset.pattern.permute.xlu1 %v277_v7 }
   0x2   :  { %v237_v3 = vpack.c.bf16 %v27_v1, %v26_v0  ;;  %v29_v4 = vld [vmem:[%s376_s0 + $0x18] sm:$0xff]  ;;  %v22_v5 = vld [vmem:[%s377_s1] sm:$0xff]  ;;  %v24_v6 = vld [vmem:[%s377_s1 + $0x10] sm:$0xff] }
   0x3   :  { %v241_v8 = vpack.c.bf16 %v29_v4, %v28_v2  ;;  %231 = vmatprep.mubr.msk.f32.mxu0 %vm54_vm0, %v22_v5  ;;  %234 = vmatprep.mubr.msk.f32.mxu1 %vm54_vm0, %v24_v6  ;;  %v30_v9 = vld [vmem:[%s378_s2] sm:$0xff]  ;;  %v32_v10 = vld [vmem:[%s378_s2 + $0x10] sm:$0xff] }
   0x4   :  { %238 = vmatprep.subr.bf16.mxu0 %v237_v3  ;;  %245 = vmatprep.subr.bf16.mxu1 %v237_v3 }
   0x5   :  { %240 = vmatpush3.bf16.msra.mxu0 %v237_v3  ;;  %247 = vmatpush3.bf16.msra.mxu1 %v237_v3 }
   0x6   :  { %242 = vmatprep.subr.bf16.mxu0 %v241_v8  ;;  %246 = vmatprep.subr.bf16.mxu1 %v241_v8 }
   0x7   :  { %11 = vsyncpa [#allocation4], 0  ;;  %36 = vperm.xlu0 %251, %v30_v9   ;;  %46 = vperm.xlu1 %252, %v32_v10   ;;  %v31_v11 = vld [vmem:[%s378_s2 + $0x8] sm:$0xff]  ;;  %v33_v12 = vld [vmem:[%s378_s2 + $0x18] sm:$0xff]  ;;  %v194_v51 = vstv %s380_s4  ;;  %s278_s23 = smov [#allocation3]  }
   0x8   :  { %v23_v13 = vld [vmem:[%s377_s1 + $0x8] sm:$0xff]  ;;  %v25_v14 = vld [vmem:[%s377_s1 + $0x18] sm:$0xff]  ;;  %v156_v15 = vld [vmem:[%s379_s3] sm:$0xff]  ;;  %s203_s24 = sshll.u32 %s278_s23, 4  ;;  %s204_s24 = int_to_ptr.vmem [resolvable:$true] %s203_s24 }
   0x9   :  { %244 = vmatpush3.bf16.msra.mxu0 %v241_v8  ;;  %248 = vmatpush3.bf16.msra.mxu1 %v241_v8  ;;  %v157_v16 = vld [vmem:[%s379_s3 + $0x8] sm:$0xff]  ;;  %v158_v17 = vld [vmem:[%s379_s3 + $0x10] sm:$0xff]  ;;  %v159_v18 = vld [vmem:[%s379_s3 + $0x18] sm:$0xff]  ;;  %s253_s25 = scalar_lea.vmem %s204_s24, 16  ;;  %s257_s26 = scalar_lea.vmem %s204_s24, 32 }
   0xa   :  { %p254_p0 = scmp.ne.s32.totalorder %s204_s24, %s253_s25  ;;  %p258_p1 = scmp.lt.s32.totalorder %s204_s24, %s204_s24 }
   0xb   :  { %41 = vperm.xlu0 %251, %v31_v11   ;;  %51 = vperm.xlu1 %252, %v33_v12   ;;  %p259_p2 = scmp.lt.s32.totalorder %s257_s26, %s253_s25 }
   0xc   :  { %232 = vmatmul.mubr.msk.f32.vlgmr.msra.gmra.mrb[0].mxu0 %vm54_vm0, %v23_v13  ;;  %235 = vmatmul.mubr.msk.f32.vlgmr.msra.gmra.mrb[0].mxu1 %vm54_vm0, %v25_v14 }
   0xd   :  { %p260_p3 = por %p259_p2, %p258_p1 }
   0xf   :  { %162 = vperm.xlu0 %251, %v156_v15   ;;  %167 = vperm.xlu1 %252, %v157_v16   ;;  %p261_p4 = pnand %p260_p3, %p254_p0 }
  0x13   :  { %172 = vperm.xlu0 %251, %v158_v17   ;;  %177 = vperm.xlu1 %252, %v159_v18  }
  0x86   :  { %v37_v19 = vpop.permute.xlu0 %36  ;;  %v47_v20 = vpop.permute.xlu1 %46 }
  0x8a   :  { %v42_v21 = vpop.permute.xlu0 %41  ;;  %v52_v22 = vpop.permute.xlu1 %51 }
  0x8e   :  { %v163_v23 = vpop.permute.xlu0 %162  ;;  %v168_v32 = vpop.permute.xlu1 %167 }
  0x92   :  { %v173_v39 = vpop.permute.xlu0 %172  ;;  %v178_v42 = vpop.permute.xlu1 %177 }
  0xdf   :  { %v233_v24 = vpop.f32.mrb[0].mxu0  ;;  %v236_v25 = vpop.f32.mrb[0].mxu1 }
  0xe0   :  { %v139_v26 = vadd.f32 %v233_v24, %v42_v21  ;;  %v133_v27 = vpop.f32.mrb[1].mxu0  ;;  %v143_v28 = vpop.f32.mrb[1].mxu1  ;;  %v149_v29 = vadd.f32 %v236_v25, %v52_v22 }
  0xe1   :  { %v134_v30 = vadd.f32 %v133_v27, %v37_v19  ;;  %v144_v31 = vadd.f32 %v143_v28, %v47_v20 }
  0xe2   :  { %v153_v33 = vmax.f32 %v139_v26, 0.0  ;;  %v155_v37 = vmax.f32 %v149_v29, 0.0 }
  0xe3   :  { %v152_v34 = vmax.f32 %v134_v30, 0.0  ;;  %v154_v35 = vmax.f32 %v144_v31, 0.0 }
  0xe4   :  { %v181_v36 = vmul.f32 %v168_v32, %v153_v33  ;;  %v183_v43 = vmul.f32 %v178_v42, %v155_v37 }
  0xe5   :  { %v180_v38 = vmul.f32 %v163_v23, %v152_v34  ;;  %v182_v41 = vmul.f32 %v173_v39, %v154_v35 }
  0xe7   :  { %v184_v40 = vadd.f32 %v181_v36, %v180_v38 }
  0xe9   :  { %v185_v44 = vadd.f32 %v184_v40, %v182_v41 }
  0xeb   :  { %v186_v45 = vadd.f32 %v185_v44, %v183_v43 }
  0xed   :  { %v187_v46 = vrot.slane %v186_v45, 4 }
  0xef   :  { %v188_v47 = vadd.f32 %v187_v46, %v186_v45 }
  0xf1   :  { %v189_v48 = vrot.slane %v188_v47, 2 }
  0xf3   :  { %v190_v49 = vadd.f32 %v189_v48, %v188_v47 }
  0xf5   :  { %v191_v50 = vrot.slane %v190_v49, 1 }
  0xf7   :  { %v192_v52 = vadd.f32 %v191_v50, %v190_v49 }
  0xf9   :  { %v195_v53 = vadd.f32 %v194_v51, %v192_v52 }
  0xfb   :  { %196 = vst [vmem:[#allocation3] sm:$0x1] %v195_v53 }
  0xfc   :  { %264 = shalt.err (!%p261_p4)
}
  0xfd   :  { %s265_s29 = scalar_lea.hbm %s381_s5, 16 }
  0xfe   :  { %p266_p5 = scmp.ne.s32.totalorder %s381_s5, %s265_s29  ;;  %p269_p6 = scmp.lt.u32.totalorder %s265_s29, %s381_s5 }
 0x100   :  { %p271_p7 = pnand %p269_p6, %p266_p5 }
 0x102   :  { %274 = shalt.err (!%p271_p7)
}
 0x103   :  { %206 = dma.vmem_to_hbm [thread:$0]  %s204_s24, 16, %s381_s5, [#allocation4]  }
 0x104   :  { %275 = dma.done.wait [#allocation4], 16  }
 0x105   :  { %276 = vsyncadd [#allocation4], 4294967280 }
 0x106   :  { %210 = vsyncpa [#allocation4], 1 }

</bundles_post_ra>
